<compile_context>
chip_gen: v7x
topology: tpu7x:2x2x1
jax: 0.10.0
libtpu: 0.0.40
codegen_flags: <defaults>
</compile_context>

<pallas_src>
import math

import jax
import jax.numpy as jnp
from jax.experimental import pallas as pl
from jax.experimental.pallas import tpu as pltpu


def _make_flash_mha_kernel(scale, has_mask):
    """Flash-style online-softmax MHA kernel, grid (B*H, q_tiles, kv_tiles)."""
    # masked_fill(-1e10) happens BEFORE /sqrt(dk) in PyTorch; since the scale
    # is folded into q, the masked score value is -1e10 * scale.
    neg_masked = float(-1e10 * scale)

    def kernel(*refs):
        if has_mask:
            q_ref, k_ref, v_ref, mask_ref, o_ref, m_sc, l_sc, acc_sc = refs
        else:
            q_ref, k_ref, v_ref, o_ref, m_sc, l_sc, acc_sc = refs

        kv = pl.program_id(2)   # innermost ("arbitrary") reduction axis

        @pl.when(kv == 0)
        def _init():
            m_sc[...] = jnp.full(m_sc.shape, -jnp.inf, dtype=jnp.float32)
            l_sc[...] = jnp.zeros(l_sc.shape, dtype=jnp.float32)
            acc_sc[...] = jnp.zeros(acc_sc.shape, dtype=jnp.float32)

        # Inputs are already bf16 (cast fused into the wrapper layout copy);
        # 1/sqrt(dk) is folded into q in that same copy -> no per-step VALU
        # scale/cast work inside the kv loop.
        q = q_ref[...]                       # (tq, dk) bf16, pre-scaled
        k = k_ref[...]                       # (tk, dk) bf16
        v = v_ref[...]                       # (tk, dv) bf16

        # Scores on the MXU with f32 accumulation.
        s = jnp.dot(q, k.T, preferred_element_type=jnp.float32)   # (tq, tk)
        if has_mask:
            # Exact masked_fill replacement semantics (not an additive bias).
            s = jnp.where(mask_ref[...] != 0, jnp.float32(neg_masked), s)

        # Online-softmax update (f32 on VPU/EUP).
        m_prev = m_sc[...]
        m_new = jnp.maximum(m_prev, jnp.max(s, axis=-1, keepdims=True))
        alpha = jnp.exp(m_prev - m_new)
        p = jnp.exp(s - m_new)
        l_sc[...] = alpha * l_sc[...] + jnp.sum(p, axis=-1, keepdims=True)
        acc_sc[...] = alpha * acc_sc[...] + jnp.dot(
            p.astype(jnp.bfloat16), v, preferred_element_type=jnp.float32)
        m_sc[...] = m_new

        @pl.when(kv == pl.num_programs(2) - 1)
        def _finalize():
            # Exact division: once per q-tile, negligible cost, better parity
            # with the f32 reference than approx reciprocal.
            o_ref[...] = (acc_sc[...] / l_sc[...]).astype(o_ref.dtype)

    return kernel


def _pick_tile(length, cap):
    if length <= cap:
        return length
    for t in (256, 128, 64, 32, 16, 8):
        if t <= cap and length % t == 0:
            return t
    return length   # fallback: single full-length tile


def _spec(block_shape, index_map, pipe=None):
    if pipe is None:
        return pl.BlockSpec(block_shape, index_map)
    return pl.BlockSpec(block_shape, index_map, pipeline_mode=pipe)


def multi_head_attention(Q, K, V, mask=None, *, dk, dv, num_heads, out_dtype=None):
    """Pallas TPU forward of the PyTorch MultiHeadAttention module."""
    B, Lq, EQ = Q.shape
    Lk = K.shape[1]
    H = num_heads
    assert EQ == H * dk and K.shape[-1] == H * dk and V.shape[-1] == H * dv
    out_dtype = Q.dtype if out_dtype is None else out_dtype

    scale = 1.0 / math.sqrt(dk)
    has_mask = mask is not None

    # --- tiling: large tiles amortize the ~0.35us per-grid-step overhead and
    # cut K/V re-fetch traffic; tk=256 fills the 256-wide MXU on v6e/v7x. ---
    try:
        kind = jax.devices()[0].device_kind.lower()
    except Exception:
        kind = ""
    is_v5e = ("v5e" in kind) or ("v5 lite" in kind) or ("v5lite" in kind)
    tq_cap = 256
    tk_cap = 128 if is_v5e else 256

    tq = _pick_tile(Lq, tq_cap)
    tk = _pick_tile(Lk, tk_cap)
    q_tiles, kv_tiles = Lq // tq, Lk // tk
    grid = (B * H, q_tiles, kv_tiles)

    # Deeper K/V pipelining only when the kv axis actually has enough steps.
    kv_pipe = pl.Buffered(3) if kv_tiles > 2 else None

    # --- bf16 MXU operands, scale folded into the Q copy (fused by XLA into
    # the existing cast / transpose copy, so it is free). ---
    direct = (dk % 128 == 0) and (dv % 128 == 0)
    # TODO(synk): with dk/dv < 128 (e.g. dk=dv=8 below) the head dim uses only
    # dk of 128 lanes and the MXU contraction depth is dk; padding the head dim
    # to 128 or packing heads onto the lane axis is needed for real MXU
    # utilization at tiny head dims.
    if direct:
        # Index heads straight out of the last dim of (B, L, H*d): no wrapper
        # transpose round-trip, lane-dense (B, Lq, H*dv) output slab.
        qh = (Q.astype(jnp.float32) * scale).astype(jnp.bfloat16)
        kh = K.astype(jnp.bfloat16)
        vh = V.astype(jnp.bfloat16)
        q_spec = pl.BlockSpec((None, tq, dk), lambda bh, qi, ki: (bh // H, qi, bh % H))
        k_spec = _spec((None, tk, dk), lambda bh, qi, ki: (bh // H, ki, bh % H), kv_pipe)
        v_spec = _spec((None, tk, dv), lambda bh, qi, ki: (bh // H, ki, bh % H), kv_pipe)
        o_spec = pl.BlockSpec((None, tq, dv), lambda bh, qi, ki: (bh // H, qi, bh % H))
        out_shape = jax.ShapeDtypeStruct((B, Lq, H * dv), out_dtype)
    else:
        # Head-major (B*H, L, d) layout — same view+transpose PyTorch performs;
        # bf16 cast (and Q scaling) fused into this copy.
        qh = (Q.astype(jnp.float32) * scale).astype(jnp.bfloat16).reshape(
            B, Lq, H, dk).transpose(0, 2, 1, 3).reshape(B * H, Lq, dk)
        kh = K.astype(jnp.bfloat16).reshape(
            B, Lk, H, dk).transpose(0, 2, 1, 3).reshape(B * H, Lk, dk)
        vh = V.astype(jnp.bfloat16).reshape(
            B, Lk, H, dv).transpose(0, 2, 1, 3).reshape(B * H, Lk, dv)
        q_spec = pl.BlockSpec((None, tq, dk), lambda bh, qi, ki: (bh, qi, 0))
        k_spec = _spec((None, tk, dk), lambda bh, qi, ki: (bh, ki, 0), kv_pipe)
        v_spec = _spec((None, tk, dv), lambda bh, qi, ki: (bh, ki, 0), kv_pipe)
        o_spec = pl.BlockSpec((None, tq, dv), lambda bh, qi, ki: (bh, qi, 0))
        out_shape = jax.ShapeDtypeStruct((B * H, Lq, dv), out_dtype)

    in_specs = [q_spec, k_spec, v_spec]
    inputs = [qh, kh, vh]
    if has_mask:
        # int8 mask: 4x less mask DMA than the old dense f32 bias.
        in_specs.append(_spec((tq, tk), lambda bh, qi, ki: (qi, ki), kv_pipe))
        inputs.append(mask.astype(jnp.int8))

    grid_spec = pltpu.PrefetchScalarGridSpec(
        num_scalar_prefetch=0,
        grid=grid,
        in_specs=in_specs,
        out_specs=o_spec,
        scratch_shapes=[
            pltpu.VMEM((tq, 1), jnp.float32),    # running max  m
            pltpu.VMEM((tq, 1), jnp.float32),    # running sum  l
            pltpu.VMEM((tq, dv), jnp.float32),   # un-normalized accumulator
        ],
    )

    itemsize_out = jnp.dtype(out_dtype).itemsize
    flops = 2 * B * H * Lq * Lk * (dk + dv)
    transcendentals = B * H * Lq * (Lk + kv_tiles)          # p exps + alpha exps
    bytes_accessed = (2 * qh.size                            # Q streamed once (bf16)
                      + 2 * (kh.size + vh.size) * q_tiles    # K/V re-fetched per q-tile
                      + (B * H * q_tiles * kv_tiles * tq * tk if has_mask else 0)
                      + itemsize_out * B * Lq * H * dv)

    out = pl.pallas_call(
        _make_flash_mha_kernel(scale, has_mask),
        grid_spec=grid_spec,
        out_shape=out_shape,
        compiler_params=pltpu.CompilerParams(
            # Leading (B*H) parallel axis lets v7x's 2 TensorCores split work.
            dimension_semantics=("parallel", "parallel", "arbitrary"),
            # 48 MiB: safe within v7x's 64 MiB/TC, plenty on v5e/v6e (128 MiB).
            vmem_limit_bytes=48 * 1024 * 1024,
        ),
        cost_estimate=pl.CostEstimate(
            flops=int(flops),
            transcendentals=int(transcendentals),
            bytes_accessed=int(bytes_accessed),
        ),
    )(*inputs)

    if direct:
        return out
    # Concat(): (B*H, Lq, dv) -> (B, Lq, H*dv)   (wrapper layout plumbing)
    return out.reshape(B, H, Lq, dv).transpose(0, 2, 1, 3).reshape(B, Lq, H * dv)


def reference(Q, K, V, mask, *, dk, dv, num_heads):
    # Pure-JAX (f32) mirror of the PyTorch forward, for validation only.
    B, Lq, _ = Q.shape
    Lk = K.shape[1]
    H = num_heads
    q = Q.reshape(B, Lq, H, dk).transpose(0, 2, 1, 3)
    k = K.reshape(B, Lk, H, dk).transpose(0, 2, 1, 3)
    v = V.reshape(B, Lk, H, dv).transpose(0, 2, 1, 3)
    if mask is None:
        mask = jnp.zeros((Lq, Lk), dtype=jnp.bool_)
    s = jnp.einsum('bhqd,bhkd->bhqk', q, k)
    s = jnp.where(mask[None, None], jnp.float32(-1e10), s) / math.sqrt(dk)
    p = jax.nn.softmax(s, axis=-1)
    o = jnp.einsum('bhqk,bhkd->bhqd', p, v)
    return o.transpose(0, 2, 1, 3).reshape(B, Lq, H * dv)


if __name__ == "__main__":
    # Small shapes consistent with the module: embed = num_heads * dk = 32.
    B, S, H, dk, dv = 2, 8, 4, 8, 8

    key = jax.random.PRNGKey(0)
    k_q, k_k, k_v = jax.random.split(key, 3)
    Q = jax.random.normal(k_q, (B, S, H * dk), jnp.float32)
    K = jax.random.normal(k_k, (B, S, H * dk), jnp.float32)
    V = jax.random.normal(k_v, (B, S, H * dv), jnp.float32)

    # 1) mask=None (module default: all-False mask) -> specialized no-mask kernel.
    out = multi_head_attention(Q, K, V, None, dk=dk, dv=dv, num_heads=H)
    out = jax.block_until_ready(out)
    ref = reference(Q, K, V, None, dk=dk, dv=dv, num_heads=H)
    assert out.shape == (B, S, H * dv)
    # bf16 MXU operands -> looser tolerance than pure f32.
    assert jnp.allclose(out, ref, atol=5e-2, rtol=5e-2), \
        float(jnp.max(jnp.abs(out - ref)))

    # 2) explicit boolean mask (causal; True == masked position).
    causal = jnp.triu(jnp.ones((S, S), dtype=jnp.bool_), k=1)
    out_m = multi_head_attention(Q, K, V, causal, dk=dk, dv=dv, num_heads=H)
    out_m = jax.block_until_ready(out_m)
    ref_m = reference(Q, K, V, causal, dk=dk, dv=dv, num_heads=H)
    assert jnp.allclose(out_m, ref_m, atol=5e-2, rtol=5e-2), \
        float(jnp.max(jnp.abs(out_m - ref_m)))

    print("KERNEL_OK")
</pallas_src>

<mosaic_0001>
module attributes {stable_mosaic.version = 11 : i64} {
  func.func @kernel(%arg0: i32, %arg1: i32, %arg2: i32, %arg3: memref<1x8x8xbf16, #tpu.memory_space<vmem>>, %arg4: memref<1x8x8xbf16, #tpu.memory_space<vmem>>, %arg5: memref<1x8x8xbf16, #tpu.memory_space<vmem>>, %arg6: memref<1x8x8xf32, #tpu.memory_space<vmem>>, %arg7: memref<8x1xf32, #tpu.memory_space<vmem>>, %arg8: memref<8x1xf32, #tpu.memory_space<vmem>>, %arg9: memref<8x8xf32, #tpu.memory_space<vmem>>) attributes {dimension_semantics = [#tpu.dimension_semantics<parallel>, #tpu.dimension_semantics<parallel>, #tpu.dimension_semantics<arbitrary>], iteration_bounds = array<i64: 8, 1, 1>, scalar_prefetch = 0 : i64, scratch_operands = 3 : i64, tpu.core_type = #tpu.core_type<tc>, window_params = [{transform_indices = @transform_0, window_bounds = array<i64: 1, 8, 8>}, {transform_indices = @transform_1, window_bounds = array<i64: 1, 8, 8>}, {transform_indices = @transform_2, window_bounds = array<i64: 1, 8, 8>}, {transform_indices = @transform_3, window_bounds = array<i64: 1, 8, 8>}]} {
    %c0_i32 = arith.constant 0 : i32
    %0 = arith.cmpi eq, %arg2, %c0_i32 : i32
    %1 = arith.extui %0 : i1 to i32
    %c0_i32_0 = arith.constant 0 : i32
    %2 = arith.cmpi ne, %1, %c0_i32_0 : i32
    scf.if %2 {
      %cst_26 = arith.constant 0xFF800000 : f32
      %37 = vector.broadcast %cst_26 : f32 to vector<8x1xf32>
      %c0_27 = arith.constant 0 : index
      %c0_28 = arith.constant 0 : index
      %38 = vector.load %arg7[%c0_27, %c0_28] : memref<8x1xf32, #tpu.memory_space<vmem>>, vector<8x1xf32>
      tpu.vector_store %arg7[%c0_27, %c0_28], %37 {strides = array<i32>} : memref<8x1xf32, #tpu.memory_space<vmem>>, vector<8x1xf32>,
      %cst_29 = arith.constant 0.000000e+00 : f32
      %39 = vector.broadcast %cst_29 : f32 to vector<8x1xf32>
      %c0_30 = arith.constant 0 : index
      %c0_31 = arith.constant 0 : index
      %40 = vector.load %arg8[%c0_30, %c0_31] : memref<8x1xf32, #tpu.memory_space<vmem>>, vector<8x1xf32>
      tpu.vector_store %arg8[%c0_30, %c0_31], %39 {strides = array<i32>} : memref<8x1xf32, #tpu.memory_space<vmem>>, vector<8x1xf32>,
      %cst_32 = arith.constant 0.000000e+00 : f32
      %41 = vector.broadcast %cst_32 : f32 to vector<8x8xf32>
      %c0_33 = arith.constant 0 : index
      %c0_34 = arith.constant 0 : index
      %42 = vector.load %arg9[%c0_33, %c0_34] : memref<8x8xf32, #tpu.memory_space<vmem>>, vector<8x8xf32>
      tpu.vector_store %arg9[%c0_33, %c0_34], %41 {strides = array<i32>} : memref<8x8xf32, #tpu.memory_space<vmem>>, vector<8x8xf32>,
    } else {
    }
    %c0 = arith.constant 0 : index
    %c0_1 = arith.constant 0 : index
    %c0_2 = arith.constant 0 : index
    %3 = vector.load %arg3[%c0, %c0_1, %c0_2] : memref<1x8x8xbf16, #tpu.memory_space<vmem>>, vector<1x8x8xbf16>
    %4 = vector.shape_cast %3 : vector<1x8x8xbf16> to vector<8x8xbf16>
    %c0_3 = arith.constant 0 : index
    %c0_4 = arith.constant 0 : index
    %c0_5 = arith.constant 0 : index
    %5 = vector.load %arg4[%c0_3, %c0_4, %c0_5] : memref<1x8x8xbf16, #tpu.memory_space<vmem>>, vector<1x8x8xbf16>
    %6 = vector.shape_cast %5 : vector<1x8x8xbf16> to vector<8x8xbf16>
    %c0_6 = arith.constant 0 : index
    %c0_7 = arith.constant 0 : index
    %c0_8 = arith.constant 0 : index
    %7 = vector.load %arg5[%c0_6, %c0_7, %c0_8] : memref<1x8x8xbf16, #tpu.memory_space<vmem>>, vector<1x8x8xbf16>
    %8 = vector.shape_cast %7 : vector<1x8x8xbf16> to vector<8x8xbf16>
    %9 = tpu.transpose %6, [1, 0] : vector<8x8xbf16> -> vector<8x8xbf16>
    %cst = arith.constant dense<0.000000e+00> : vector<8x8xf32>
    %10 = tpu.matmul %4, %9, %cst {dimension_numbers = #tpu.dot_dimension_numbers<[1], [0], [0], [1], [0, 0, 1, 1], [], []>} : vector<8x8xbf16>, vector<8x8xbf16>, vector<8x8xf32> -> vector<8x8xf32>
    %c0_9 = arith.constant 0 : index
    %c0_10 = arith.constant 0 : index
    %11 = vector.load %arg7[%c0_9, %c0_10] : memref<8x1xf32, #tpu.memory_space<vmem>>, vector<8x1xf32>
    %cst_11 = arith.constant dense<0xFF800000> : vector<8xf32>
    %12 = vector.multi_reduction <maximumf>, %10, %cst_11 [1] : vector<8x8xf32> to vector<8xf32>
    %13 = vector.shape_cast %12 : vector<8xf32> to vector<8x1xf32>
    %14 = arith.maximumf %11, %13 : vector<8x1xf32>
    %15 = arith.subf %11, %14 : vector<8x1xf32>
    %16 = math.exp %15 : vector<8x1xf32>
    %17 = vector.broadcast %14 : vector<8x1xf32> to vector<8x8xf32>
    %18 = arith.subf %10, %17 : vector<8x8xf32>
    %19 = math.exp %18 : vector<8x8xf32>
    %c0_12 = arith.constant 0 : index
    %c0_13 = arith.constant 0 : index
    %20 = vector.load %arg8[%c0_12, %c0_13] : memref<8x1xf32, #tpu.memory_space<vmem>>, vector<8x1xf32>
    %21 = arith.mulf %16, %20 : vector<8x1xf32>
    %cst_14 = arith.constant dense<0.000000e+00> : vector<8xf32>
    %22 = vector.multi_reduction <add>, %19, %cst_14 [1] : vector<8x8xf32> to vector<8xf32>
    %23 = vector.shape_cast %22 : vector<8xf32> to vector<8x1xf32>
    %24 = arith.addf %21, %23 : vector<8x1xf32>
    %c0_15 = arith.constant 0 : index
    %c0_16 = arith.constant 0 : index
    %25 = vector.load %arg8[%c0_15, %c0_16] : memref<8x1xf32, #tpu.memory_space<vmem>>, vector<8x1xf32>
    tpu.vector_store %arg8[%c0_15, %c0_16], %24 {strides = array<i32>} : memref<8x1xf32, #tpu.memory_space<vmem>>, vector<8x1xf32>,
    %c0_17 = arith.constant 0 : index
    %c0_18 = arith.constant 0 : index
    %26 = vector.load %arg9[%c0_17, %c0_18] : memref<8x8xf32, #tpu.memory_space<vmem>>, vector<8x8xf32>
    %27 = vector.broadcast %16 : vector<8x1xf32> to vector<8x8xf32>
    %28 = arith.mulf %27, %26 : vector<8x8xf32>
    %29 = arith.truncf %19 : vector<8x8xf32> to vector<8x8xbf16>
    %cst_19 = arith.constant dense<0.000000e+00> : vector<8x8xf32>
    %30 = tpu.matmul %29, %8, %cst_19 {dimension_numbers = #tpu.dot_dimension_numbers<[1], [0], [0], [1], [0, 0, 1, 1], [], []>} : vector<8x8xbf16>, vector<8x8xbf16>, vector<8x8xf32> -> vector<8x8xf32>
    %31 = arith.addf %28, %30 : vector<8x8xf32>
    %c0_20 = arith.constant 0 : index
    %c0_21 = arith.constant 0 : index
    %32 = vector.load %arg9[%c0_20, %c0_21] : memref<8x8xf32, #tpu.memory_space<vmem>>, vector<8x8xf32>
    tpu.vector_store %arg9[%c0_20, %c0_21], %31 {strides = array<i32>} : memref<8x8xf32, #tpu.memory_space<vmem>>, vector<8x8xf32>,
    %c0_22 = arith.constant 0 : index
    %c0_23 = arith.constant 0 : index
    %33 = vector.load %arg7[%c0_22, %c0_23] : memref<8x1xf32, #tpu.memory_space<vmem>>, vector<8x1xf32>
    tpu.vector_store %arg7[%c0_22, %c0_23], %14 {strides = array<i32>} : memref<8x1xf32, #tpu.memory_space<vmem>>, vector<8x1xf32>,
    %c0_i32_24 = arith.constant 0 : i32
    %34 = arith.cmpi eq, %arg2, %c0_i32_24 : i32
    %35 = arith.extui %34 : i1 to i32
    %c0_i32_25 = arith.constant 0 : i32
    %36 = arith.cmpi ne, %35, %c0_i32_25 : i32
    scf.if %36 {
      %c0_26 = arith.constant 0 : index
      %c0_27 = arith.constant 0 : index
      %37 = vector.load %arg9[%c0_26, %c0_27] : memref<8x8xf32, #tpu.memory_space<vmem>>, vector<8x8xf32>
      %c0_28 = arith.constant 0 : index
      %c0_29 = arith.constant 0 : index
      %38 = vector.load %arg8[%c0_28, %c0_29] : memref<8x1xf32, #tpu.memory_space<vmem>>, vector<8x1xf32>
      %39 = vector.broadcast %38 : vector<8x1xf32> to vector<8x8xf32>
      %40 = arith.divf %37, %39 : vector<8x8xf32>
      %c0_30 = arith.constant 0 : index
      %c0_31 = arith.constant 0 : index
      %c0_32 = arith.constant 0 : index
      %41 = vector.load %arg6[%c0_30, %c0_31, %c0_32] : memref<1x8x8xf32, #tpu.memory_space<vmem>>, vector<1x8x8xf32>
      %42 = vector.shape_cast %41 : vector<1x8x8xf32> to vector<8x8xf32>
      %43 = vector.shape_cast %40 : vector<8x8xf32> to vector<1x8x8xf32>
      tpu.vector_store %arg6[%c0_30, %c0_31, %c0_32], %43 {strides = array<i32>} : memref<1x8x8xf32, #tpu.memory_space<vmem>>, vector<1x8x8xf32>,
    } else {
    }
    return
  }
  func.func @transform_0(%arg0: i32, %arg1: i32, %arg2: i32) -> (i32, i32, i32) {
    %c0_i32 = arith.constant 0 : i32
    %c0_i32_0 = arith.constant 0 : i32
    return %arg0, %arg1, %c0_i32 : i32, i32, i32
  }
  func.func @transform_1(%arg0: i32, %arg1: i32, %arg2: i32) -> (i32, i32, i32) {
    %c0_i32 = arith.constant 0 : i32
    %c0_i32_0 = arith.constant 0 : i32
    return %arg0, %arg2, %c0_i32 : i32, i32, i32
  }
  func.func @transform_2(%arg0: i32, %arg1: i32, %arg2: i32) -> (i32, i32, i32) {
    %c0_i32 = arith.constant 0 : i32
    %c0_i32_0 = arith.constant 0 : i32
    return %arg0, %arg2, %c0_i32 : i32, i32, i32
  }
  func.func @transform_3(%arg0: i32, %arg1: i32, %arg2: i32) -> (i32, i32, i32) {
    %c0_i32 = arith.constant 0 : i32
    %c0_i32_0 = arith.constant 0 : i32
    return %arg0, %arg1, %c0_i32 : i32, i32, i32
  }
}

</mosaic_0001>

<bundles_post_ra>
// kernel: tpu_custom_call.1
= control target key start
LH: loop header
LB: loop body
LE: loop exit
PB: predicated region body
PF: predicated region fallthrough
CT: control target
= control target key end

     0   :  { %s1186_s0 = inlined_call_operand.hbm [shape: bf16[8,8,8], index: 0, kind: input, shape index: {}]   ;;  %s1187_s1 = inlined_call_operand.hbm [shape: bf16[8,8,8], index: 1, kind: input, shape index: {}]   ;;  %s1188_s2 = inlined_call_operand.hbm [shape: bf16[8,8,8], index: 2, kind: input, shape index: {}]   ;;  %s1189_s3 = inlined_call_operand.hbm [shape: f32[8,8,8], index: 3, kind: output, shape index: {}]  }
   0x1   :  { %1195 = sst [smem:[#allocation18_spill]] %s1187_s1 }
   0x2   :  { %8 = vsyncpa [#allocation6], 0 }
   0x3   :  { %10 = vsyncpa [#allocation6 + $0x1], 0 }
   0x4   :  { %11 = vsyncpa [#allocation9], 0 }
   0x5   :  { %13 = vsyncpa [#allocation9 + $0x1], 0 }
   0x6   :  { %14 = vsyncpa [#allocation7], 0 }
   0x7   :  { %16 = vsyncpa [#allocation7 + $0x1], 0  ;;  %s912_s12 = smov 0   ;;  %s914_s13 = smov 0  }
   0x8   :  { %s916_s14 = smov 0   ;;  %s918_s15 = smov 0  }
   0x9   :  { %s920_s16 = smov 0   ;;  %s922_s17 = smov 0  }
   0xa LB: > { %1196 = sst [smem:[#allocation15_spill]] %s878_s16  ;;  %s943_s18 = sadd.s32 4294967295, %s882_s17   ;;  %s882_s17 = sphi %s922_s17, %s22_s17   ;;  %s878_s16 = sphi %s920_s16, %s1216_s16   ;;  %s874_s15 = sphi %s918_s15, %s1215_s15   ;;  %s870_s14 = sphi %s916_s14, %s1219_s14   ;;  %s866_s13 = sphi %s914_s13, %s1218_s13   ;;  %s862_s12 = sphi %s912_s12, %s1217_s12  }
   0xb   : > { %s586_s19 = sadd.s32 4294967294, %s882_s17   ;;  %s41_s20 = sadd.s32 1, %s878_s16 }
   0xc   : > { %s50_s21 = sadd.s32 1, %s870_s14  ;;  %p43_p0 = scmp.ge.s32.totalorder %s41_s20, 8 }
   0xd   : > { %p57_p1 = scmp.ne.s32.totalorder %s870_s14, %s866_s13  ;;  %p58_p2 = scmp.eq.s32.totalorder %s882_s17, 0 }
   0xe   : > { %p63_p3 = scmp.ne.s32.totalorder %s866_s13, %s862_s12  ;;  %s1221_s20 = smov (%p43_p0, %s41_s20), 0 }
   0xf   : > { %1197 = sst [smem:[#allocation16_spill]] %s1221_s20  ;;  %p955_p4 = por %p58_p2, %p57_p1 }
  0x10   : > { %p64_p5 = scmp.eq.s32.totalorder %s943_s18, 0  ;;  %s45_s23 = ssub.s32 %s878_s16, %s1221_s20 }
  0x11   : > { %p145_p6 = scmp.eq.s32.totalorder %s943_s18, 7  ;;  %p48_p7 = scmp.eq.s32.totalorder %s45_s23, 0 }
  0x12   : > { %p963_p8 = por %p64_p5, %p63_p3  ;;  %p151_p10 = scmp.eq.s32.totalorder %s586_s19, 7 }
  0x13   : > { %p967_p9 = por %p145_p6, %p57_p1  ;;  %p644_p12 = scmp.lt.s32.totalorder %s882_s17, 8 }
  0x14   : > { %s1199_s24 = scalar_select %p963_p8, 1, 0 }
  0x15   : > { %s1200_s25 = scalar_select %p967_p9, 1, 0 }
  0x16   : > { %s972_s26 = scalar_select %p48_p7, %s870_s14, %s50_s21  }
  0x17   : > { %p974_p11 = por %p151_p10, %p63_p3  ;;  %s171_s28 = sand.u32 1, %s870_s14  }
  0x18   : > { %1201 = sst [smem:[#allocation17_spill]] %s972_s26  ;;  %s982_s29 = sshll.u32 %s171_s28, 2 }
  0x19   : > { %s1202_s27 = scalar_select %p974_p11, 1, 0 }
  0x1a   : > { %s985_s30 = sshll.u32 %s878_s16, 6  ;;  %p989_p13 = pnand %p644_p12, %p955_p4 }
  0x1b   : > { %s190_s5 = sand.u32 1, %s882_s17   ;;  %s1204_s1 = sld [smem:[#allocation18_spill]] }
  0x1c   : > { %s1203_s4 = scalar_select %p989_p13, 1, 0 }
  0x1d   : > { %s194_s9 = scalar_lea.vmem [#allocation8], %s982_s29  ;;  %s1005_s11 = scalar_lea.sflag [#allocation9], %s190_s5 }
  0x1e   : > { %s202_s10 = sshll.u32 %s194_s9, 4  ;;  %p1011_p3 = pneg %p989_p13  ;;  %s1002_s10 = int_to_ptr.vmem [resolvable:$true] %s202_s10 }
  0x21   : > { %s998_s8 = scalar_lea.hbm %s1204_s1, %s985_s30  ;;  %s711_s6 = scalar_lea.hbm %s1204_s1, 512 }
  0x22   : > { %s706_s19 = scalar_lea.hbm %s998_s8, 64  ;;  %p712_p6 = scmp.lt.u32.totalorder %s998_s8, %s1204_s1 }
  0x23   : > { %p707_p2 = scmp.ne.s32.totalorder %s998_s8, %s706_s19  ;;  %p713_p7 = scmp.lt.u32.totalorder %s711_s6, %s706_s19 }
  0x24   : > { %p715_p12 = scmp.lt.u32.totalorder %s706_s19, %s998_s8 }
  0x25   : > { %p709_p4 = pnand %p1011_p3, %p707_p2  ;;  %p714_p10 = por %p713_p7, %p712_p6 }
  0x27   : > { %p710_p5 = pneg %p709_p4  ;;  %p716_p0 = por %p715_p12, %p714_p10 }
  0x29   : > { %p717_p1 = pnand %p716_p0, %p710_p5 }
  0x2b   : > { %720 = shalt.err (!%p717_p1)
}
  0x2c   : > { %s721_s5 = scalar_lea.vmem %s1002_s10, 64  ;;  %s884_s22 = smov [#allocation8]  }
  0x2d   : > { %p722_p2 = scmp.ne.s32.totalorder %s1002_s10, %s721_s5  ;;  %s726_s23 = sshll.u32 %s884_s22, 4  ;;  %s727_s23 = int_to_ptr.vmem [resolvable:$false] %s726_s23 }
  0x2e   : > { %s728_s7 = scalar_lea.vmem %s727_s23, 128  ;;  %p729_p9 = scmp.lt.s32.totalorder %s1002_s10, %s727_s23 }
  0x2f   : > { %p724_p4 = pnand %p722_p2, %p1011_p3  ;;  %p730_p8 = scmp.lt.s32.totalorder %s728_s7, %s721_s5 }
  0x31   : > { %p725_p11 = pneg %p724_p4  ;;  %p731_p6 = por %p730_p8, %p729_p9 }
  0x33   : > { %p732_p7 = pnand %p731_p6, %p725_p11 }
  0x35   : > { %735 = shalt.err (!%p732_p7)
}
  0x36   : > { %636 = dma.hbm_to_vmem [thread:$0]  (!%p989_p13), %s998_s8, 64, %s1002_s10, %s1005_s11  }
  0x37   : > { %p1206_p0 = scmp.lt.s32.totalorder %s882_s17, 9  ;;  %p1207_p1 = scmp.ge.s32.totalorder %s882_s17, 1 }
  0x38   : > { %s1047_s5 = scalar_lea.hbm %s1186_s0, %s985_s30  ;;  %s175_s22 = scalar_lea.vmem [#allocation5], %s982_s29 }
  0x39   : > { %p1039_p5 = pnand %p1207_p1, %p1206_p0  ;;  %s183_s23 = sshll.u32 %s175_s22, 4  ;;  %s1050_s23 = int_to_ptr.vmem [resolvable:$true] %s183_s23 }
  0x3a   : > { %s1056_s7 = scalar_lea.hbm %s1188_s2, %s985_s30  ;;  %s172_s1 = scalar_lea.sflag [#allocation6], %s171_s28 }
  0x3b   : > { %s1208_s19 = scalar_select %p1039_p5, 1, 0 }
  0x3c   : > { %s736_s20 = scalar_lea.hbm %s1047_s5, 64  ;;  %s741_s16 = scalar_lea.hbm %s1186_s0, 512 }
  0x3d   : > { %p737_p8 = scmp.ne.s32.totalorder %s1047_s5, %s736_s20  ;;  %p742_p10 = scmp.lt.u32.totalorder %s1047_s5, %s1186_s0 }
  0x3e   : > { %p743_p12 = scmp.lt.u32.totalorder %s741_s16, %s736_s20  ;;  %p745_p4 = scmp.lt.u32.totalorder %s736_s20, %s1047_s5 }
  0x3f   : > { %p739_p9 = pnand %p737_p8, %p1011_p3 }
  0x40   : > { %p744_p2 = por %p743_p12, %p742_p10 }
  0x41   : > { %p740_p11 = pneg %p739_p9 }
  0x42   : > { %p746_p6 = por %p745_p4, %p744_p2 }
  0x44   : > { %p747_p7 = pnand %p746_p6, %p740_p11 }
  0x46   : > { %750 = shalt.err (!%p747_p7)
}
  0x47   : > { %s751_s28 = scalar_lea.vmem %s1050_s23, 64  ;;  %s885_s30 = smov [#allocation5]  }
  0x48   : > { %p752_p0 = scmp.ne.s32.totalorder %s1050_s23, %s751_s28  ;;  %s756_s8 = sshll.u32 %s885_s30, 4  ;;  %s757_s8 = int_to_ptr.vmem [resolvable:$false] %s756_s8 }
  0x49   : > { %s758_s26 = scalar_lea.vmem %s757_s8, 128  ;;  %p759_p9 = scmp.lt.s32.totalorder %s1050_s23, %s757_s8 }
  0x4a   : > { %p754_p1 = pnand %p752_p0, %p1011_p3  ;;  %p760_p5 = scmp.lt.s32.totalorder %s758_s26, %s751_s28 }
  0x4c   : > { %p755_p8 = pneg %p754_p1  ;;  %p761_p10 = por %p760_p5, %p759_p9 }
  0x4e   : > { %p762_p12 = pnand %p761_p10, %p755_p8 }
  0x50   : > { %765 = shalt.err (!%p762_p12)
}
  0x51   : > { %633 = dma.hbm_to_vmem [thread:$0]  (!%p989_p13), %s1047_s5, 64, %s1050_s23, %s172_s1  }
  0x52   : > { %s213_s16 = scalar_lea.vmem [#allocation10], %s982_s29  ;;  %s766_s10 = scalar_lea.hbm %s1056_s7, 64 }
  0x53   : > { %s221_s20 = sshll.u32 %s213_s16, 4  ;;  %p767_p11 = scmp.ne.s32.totalorder %s1056_s7, %s766_s10  ;;  %s222_s20 = int_to_ptr.vmem [resolvable:$true] %s221_s20 }
  0x54   : > { %s771_s22 = scalar_lea.hbm %s1188_s2, 512  ;;  %p772_p4 = scmp.lt.u32.totalorder %s1056_s7, %s1188_s2 }
  0x55   : > { %p769_p5 = pnand %p767_p11, %p1011_p3  ;;  %p773_p6 = scmp.lt.u32.totalorder %s771_s22, %s766_s10 }
  0x56   : > { %p775_p0 = scmp.lt.u32.totalorder %s766_s10, %s1056_s7 }
  0x57   : > { %p770_p2 = pneg %p769_p5  ;;  %p774_p7 = por %p773_p6, %p772_p4 }
  0x59   : > { %p776_p1 = por %p775_p0, %p774_p7 }
  0x5b   : > { %p777_p8 = pnand %p776_p1, %p770_p2 }
  0x5d   : > { %780 = shalt.err (!%p777_p8)
}
  0x5e   : > { %s781_s1 = scalar_lea.vmem %s222_s20, 64  ;;  %s886_s29 = smov [#allocation10]  }
  0x5f   : > { %p782_p9 = scmp.ne.s32.totalorder %s222_s20, %s781_s1  ;;  %s786_s5 = sshll.u32 %s886_s29, 4  ;;  %s787_s5 = int_to_ptr.vmem [resolvable:$false] %s786_s5 }
  0x60   : > { %s788_s23 = scalar_lea.vmem %s787_s5, 128  ;;  %p789_p11 = scmp.lt.s32.totalorder %s222_s20, %s787_s5 }
  0x61   : > { %p784_p10 = pnand %p782_p9, %p1011_p3  ;;  %p790_p5 = scmp.lt.s32.totalorder %s788_s23, %s781_s1 }
  0x63   : > { %p785_p12 = pneg %p784_p10  ;;  %p791_p13 = por %p790_p5, %p789_p11 }
  0x65   : > { %p792_p4 = pnand %p791_p13, %p785_p12 }
  0x67   : > { %795 = shalt.err (!%p792_p4)
}
  0x68   : > { %p1209_p6 = scmp.ne.s32.totalorder %s1203_s4, 0  ;;  %p1210_p2 = scmp.ne.s32.totalorder %s1208_s19, 0 }
  0x69   : > { %s1103_s21 = sand.u32 (!%p1210_p2), 1, %s866_s13   ;;  %p1211_p13 = scmp.ne.s32.totalorder (!%p1210_p2), %s1199_s24, 0 }
  0x6a   : > { %639 = dma.hbm_to_vmem [thread:$0]  (!%p1209_p6), %s1056_s7, 64, %s222_s20, %s1005_s11  }
  0x6b   : > { %230 = sbr.rel (%p1210_p2) target bundleno = 936 (0x3a8), region = 32  ;;  %s1106_s8 = sshll.u32 (!%p1210_p2), %s1103_s21, 2 }
  0x6c   : > { %s233_s26 = scalar_lea.sflag (!%p1210_p2), [#allocation6], %s1103_s21  ;;  %s236_s16 = scalar_lea.vmem (!%p1210_p2), [#allocation5], %s1106_s8 }
  0x72   : > { %849 = dma.done.wait (%p1211_p13), %s233_s26, 64  }
  0x73   : > { %851 = vsyncadd (%p1211_p13), %s233_s26, 4294967232  ;;  %s241_s4 = sand.u32 1, %s943_s18   ;;  %s245_s19 = scalar_lea.vmem [#allocation8], %s1106_s8 }
  0x74   : > { %s242_s11 = scalar_lea.sflag [#allocation9], %s241_s4 }
  0x75   : > { %853 = dma.done.wait (%p1211_p13), %s242_s11, 128  }
  0x76   : > { %855 = vsyncadd (%p1211_p13), %s242_s11, 4294967168  ;;  %vm295_vm0 = vcmask 64512   ;;  %v887_v0 = vmov 0.0   ;;  %vm888_vm1 = vmmov 0   ;;  %v298_v1 = vld [vmem:[%s245_s19] sm:$0xf] }
  0x77   : > { %610 = vmatprep.subr.bf16.mxu0 %v887_v0  ;;  %296 = vst.msk [vmem:[#allocation4] sm:$0xff] %vm295_vm0, %v887_v0  ;;  %612 = vmatprep.mubr.msk.bf16.mxu0 %vm888_vm1, %v887_v0  ;;  %v305_v2 = vsel %vm295_vm0, %v298_v1, 0  ;;  %v297_v3 = vld [vmem:[%s236_s16] sm:$0xf]  ;;  %vm292_vm2 = vcmask 7168   ;;  %v889_v4 = vmov -inf  }
  0x78   : > { %616 = vmatprep.subr.bf16.mxu1 %v887_v0  ;;  %618 = vmatprep.mubr.msk.bf16.mxu1 %vm888_vm1, %v887_v0  ;;  %293 = vst.msk [vmem:[#allocation2] sm:$0xff] %vm292_vm2, %v889_v4  ;;  %294 = vst.msk [vmem:[#allocation3] sm:$0xff] %vm292_vm2, %v887_v0  ;;  %v890_v10 = vmov 0   ;;  %vm382_vm3 = vcmask 1043456   ;;  %s254_s18 = scalar_lea.vmem [#allocation10], %s1106_s8  ;;  %s599_s24 = sshll.u32 %s1103_s21, 3 }
  0x79   : > { %611 = vmatpush3.bf16.xpose.msra.mxu0 %v305_v2  ;;  %698 = vset.pattern.permute.xlu0 %v890_v10  ;;  %v299_v15 = vld [vmem:[%s254_s18] sm:$0xf]  ;;  %s603_s7 = sshll.u32 %s874_s15, 7  ;;  %s286_s20 = scalar_lea.vmem [#allocation11], %s599_s24 }
  0x7a   : > { %699 = vset.pattern.permute.xlu1 %v890_v10  ;;  %v384_v16 = vsel %vm382_vm3, %v299_v15, 0  ;;  %s457_s10 = sshll.u32 %s286_s20, 4  ;;  %s1137_s22 = scalar_lea.hbm %s1189_s3, %s603_s7  ;;  %s1139_s10 = int_to_ptr.vmem [resolvable:$true] %s457_s10 }
  0x7b   : > { %617 = vmatpush3.bf16.msra.mxu1 %v384_v16  ;;  %s443_s28 = scalar_lea.sflag [#allocation7], %s1103_s21  ;;  %s796_s30 = scalar_lea.vmem %s1139_s10, 128 }
  0x7c   : > { %p797_p3 = scmp.ne.s32.totalorder %s1139_s10, %s796_s30  ;;  %p1212_p7 = scmp.ne.s32.totalorder %s1200_s25, 0 }
  0x7d   : > { %s891_s15 = smov [#allocation11]  }
  0x7e   : > { %v371_v30 = vld [vmem:[#allocation4] sm:$0xff]  ;;  %p798_p0 = pnand %p797_p3, %p1212_p7  ;;  %s800_s1 = sshll.u32 %s891_s15, 4  ;;  %s801_s1 = int_to_ptr.vmem [resolvable:$false] %s800_s1 }
  0x7f   : > { %v347_v11 = vld [vmem:[#allocation2] sm:$0xff]  ;;  %v363_v25 = vld [vmem:[#allocation3] sm:$0xff]  ;;  %s802_s29 = scalar_lea.vmem %s801_s1, 256  ;;  %p803_p8 = scmp.lt.s32.totalorder %s1139_s10, %s801_s1 }
  0x80   : > { %613 = vmatmul.mubr.msk.bf16.vlgmr.msra.gmra.mrb[0].mxu0 %vm295_vm0, %v297_v3  ;;  %p799_p1 = pneg %p798_p0  ;;  %p804_p9 = scmp.lt.s32.totalorder %s802_s29, %s796_s30 }
  0x82   : > { %p805_p10 = por %p804_p9, %p803_p8 }
  0x84   : > { %p806_p12 = pnand %p805_p10, %p799_p1 }
 0x153   : > { %v341_v5 = vpop.f32.mrb[0].mxu0 }
 0x154   : > { %v614_v6 = vpop.f32.mrb[1].mxu0  ;;  %v348_v7 = vsel %vm295_vm0, %v341_v5, -inf }
 0x155   : > { %349 = vmax.xlane.f32.xlu0 %v348_v7  ;;  %v344_v8 = vpop.f32.mrb[2].mxu0 }
 0x156   : > { %v615_v9 = vpop.f32.mrb[3].mxu0 }
 0x1e2   : > { %v350_v12 = vpop.xlane.xlu0 %349 }
 0x1e3   : > { %v351_v13 = vmax.f32 %v347_v11, %v350_v12 }
 0x1e5   : > { %v352_v14 = vsub.f32 %v347_v11, %v351_v13  ;;  %428 = vst.msk [vmem:[#allocation2] sm:$0xff] %vm292_vm2, %v351_v13  ;;  %357 = vperm.xlu0 %698, %v351_v13  }
 0x1e7   : > { %v353_v23 = vmul.f32 1.442695, %v352_v14 }
 0x264   : > { %v358_v17 = vpop.permute.xlu0 %357 }
 0x265   : > { %v360_v18 = vsub.f32 %v341_v5, %v358_v17 }
 0x267   : > { %v361_v19 = vmul.f32 1.442695, %v360_v18 }
 0x269   : > { %700 = vpow2.f32 %v361_v19 }
 0x26a   : > { %702 = vpow2.f32 %v353_v23 }
 0x273   : > { %v701_v20 = vpop.eup %700 }
 0x274   : > { %v365_v21 = vsel %vm295_vm0, %v701_v20, 0.0  ;;  %v378_v22 = vpack.c.bf16 %v701_v20, %v701_v20  ;;  %v703_v24 = vpop.eup %702 }
 0x275   : > { %366 = vadd.xlane.f32.xlu1 %v365_v21  ;;  %v364_v26 = vmul.f32 %v703_v24, %v363_v25 }
 0x276   : > { %619 = vmatmul.mubr.msk.bf16.vlgmr.msra.gmra.mrb[0].mxu1 %vm295_vm0, %v378_v22 }
 0x286   : > { %374 = vperm.xlu1 %699, %v703_v24  }
 0x302   : > { %v367_v27 = vpop.xlane.xlu1 %366 }
 0x303   : > { %v368_v28 = vadd.f32 %v367_v27, %v364_v26 }
 0x305   : > { %370 = vst.msk [vmem:[#allocation3] sm:$0xff] %vm292_vm2, %v368_v28 }
 0x306   : > { %v375_v31 = vpop.permute.xlu1 %374 }
 0x307   : > { %v377_v32 = vmul.f32 %v375_v31, %v371_v30 }
 0x30c   : > { %v433_v29 = vld [vmem:[#allocation3] sm:$0xff] }
 0x30d   : > { %436 = vperm.xlu1 %699, %v433_v29  }
 0x349   : > { %v420_v33 = vpop.f32.mrb[0].mxu1 }
 0x34a   : > { %v426_v34 = vadd.f32 %v420_v33, %v377_v32  ;;  %v620_v35 = vpop.f32.mrb[1].mxu1 }
 0x34b   : > { %v423_v36 = vpop.f32.mrb[2].mxu1 }
 0x34c   : > { %427 = vst.msk [vmem:[#allocation4] sm:$0xff] %vm295_vm0, %v426_v34  ;;  %v621_v37 = vpop.f32.mrb[3].mxu1 }
 0x353   : > { %v432_v40 = vld [vmem:[#allocation4] sm:$0xff] }
 0x38c   : > { %v437_v38 = vpop.permute.xlu1 %436 }
 0x38d   : > { %704 = vrcp.f32 %v437_v38 }
 0x397   : > { %v705_v39 = vpop.eup %704 }
 0x398   : > { %v440_v41 = vmul.f32 %v705_v39, %v432_v40 }
 0x39a   : > { %441 = vst.msk [vmem:[%s286_s20] sm:$0xff] %vm295_vm0, %v440_v41 }
 0x39b   : > { %809 = shalt.err (!%p806_p12)
}
 0x39c   : > { %s810_s5 = scalar_lea.hbm %s1137_s22, 128  ;;  %s814_s8 = scalar_lea.hbm %s1189_s3, 1024 }
 0x39d   : > { %p811_p11 = scmp.ne.s32.totalorder %s1137_s22, %s810_s5  ;;  %p815_p6 = scmp.lt.u32.totalorder %s1137_s22, %s1189_s3 }
 0x39e   : > { %p816_p2 = scmp.lt.u32.totalorder %s814_s8, %s810_s5  ;;  %p818_p3 = scmp.lt.u32.totalorder %s810_s5, %s1137_s22 }
 0x39f   : > { %p812_p5 = pnand %p811_p11, %p1212_p7 }
 0x3a0   : > { %p817_p13 = por %p816_p2, %p815_p6 }
 0x3a1   : > { %p813_p4 = pneg %p812_p5 }
 0x3a2   : > { %p819_p0 = por %p818_p3, %p817_p13 }
 0x3a4   : > { %p820_p1 = pnand %p819_p0, %p813_p4 }
 0x3a6   : > { %823 = shalt.err (!%p820_p1)
}
 0x3a7   : > { %628 = dma.vmem_to_hbm [thread:$0]  (%p1212_p7), %s1139_s10, 128, %s1137_s22, %s443_s28  }
 0x3a8 PF: > { %p645_p8 = scmp.ge.s32.totalorder %s882_s17, 2  ;;  %s469_s4 = sand.u32 1, %s862_s12  }
 0x3a9   : > { %p1213_p9 = scmp.ne.s32.totalorder %s1202_s27, 0  ;;  %s470_s11 = scalar_lea.sflag [#allocation7], %s469_s4 }
 0x3ab   : > { %p641_p10 = pnand %p645_p8, %p1213_p9 }
 0x3ad   : > { %857 = dma.done.wait (!%p641_p10), %s470_s11, 128  }
 0x3ae   : > { %859 = vsyncadd (!%p641_p10), %s470_s11, 4294967168  ;;  %s22_s17 = sadd.s32 1, %s882_s17   ;;  %s1214_s25 = sld [smem:[#allocation17_spill]] }
 0x3af   : > { %p19_p12 = scmp.ge.s32.totalorder %s22_s17, 10   ;;  %s1215_s15 = sld [smem:[#allocation15_spill]] }
 0x3b0   : > { %s1216_s16 = sld [smem:[#allocation16_spill]]  ;;  %s1217_s12 = smov %s866_s13 }
 0x3b1   : > { %s1218_s13 = smov %s870_s14  ;;  %21 = sbr.rel (!%p19_p12) target bundleno = 10 (0xa), region = 109 }
 0x3b4   : > { %s1219_s14 = smov %s1214_s25 }
 0x3b8   :  { %475 = vsyncpa [#allocation6], 1 }
 0x3b9   :  { %477 = vsyncpa [#allocation6 + $0x1], 1 }
 0x3ba   :  { %478 = vsyncpa [#allocation9], 1 }
 0x3bb   :  { %480 = vsyncpa [#allocation9 + $0x1], 1 }
 0x3bc   :  { %481 = vsyncpa [#allocation7], 1 }
 0x3bd   :  { %483 = vsyncpa [#allocation7 + $0x1], 1 }

</bundles_post_ra>
